<compile_context>
chip_gen: v7x
topology: tpu7x:2x2x1
jax: 0.10.0
libtpu: 0.0.40
codegen_flags: <defaults>
</compile_context>

<pallas_src>
import jax
import jax.numpy as jnp
from jax.experimental import pallas as pl
from jax.experimental.pallas import tpu as pltpu


def _round_up(a, b):
    return (a + b - 1) // b * b


def _attention_mlp_kernel(x_ref, w1_ref, b1_ref, w2_ref, b2_ref, o_ref):
    # x_ref:  (tm, D)  bf16 row tile
    # w1_ref: (D, 16)  bf16 (resident, constant index_map)
    # b1_ref: (1, 16)  f32
    # w2_ref: (1, 16)  f32  (w2[:, 0] as a row)
    # b2_ref: (1, 1)   f32  in SMEM
    # o_ref:  (1, tm)  f32  lane-dense output row
    h = jnp.dot(x_ref[...], w1_ref[...], preferred_element_type=jnp.float32)
    h = jnp.maximum(h + b1_ref[...], 0.0)            # bias + ReLU in f32
    # Dropout(p=0) in eval mode -> identity (no-op)
    # Second projection on VPU (mul) + XLU (lane reduce) instead of MXU.
    col = jnp.sum(h * w2_ref[...], axis=-1, keepdims=True)   # (tm, 1)
    row = jnp.transpose(col)                                  # (1, tm) XLU transpose
    o_ref[...] = (row + b2_ref[0, 0]).astype(o_ref.dtype)


def attention_layer_forward(x, w1, b1, w2, b2, *, tm=512,
                            compute_dtype=jnp.bfloat16):
    """x: (B, S, D). Weights stored as (in_features, out_features).
    Returns (B, S, 1) float32."""
    B, S, D = x.shape
    N = B * S
    H = w1.shape[1]   # 16

    # Effective row tile: multiple of 128, no larger than the padded row count.
    tm_eff = min(int(tm), _round_up(N, 128))
    tm_eff = max(128, _round_up(tm_eff, 128))
    n_pad = _round_up(N, tm_eff)
    grid = n_pad // tm_eff

    x2 = x.reshape(N, D).astype(compute_dtype)
    if n_pad != N:
        x2 = jnp.pad(x2, ((0, n_pad - N), (0, 0)))

    w1c = w1.astype(compute_dtype)                     # (D, H)
    b1r = b1.reshape(1, H).astype(jnp.float32)         # (1, H)
    w2r = w2.reshape(1, H).astype(jnp.float32)         # (1, H) == w2[:, 0] as row
    b2s = b2.reshape(1, 1).astype(jnp.float32)         # (1, 1) -> SMEM

    out2 = pl.pallas_call(
        _attention_mlp_kernel,
        out_shape=jax.ShapeDtypeStruct((grid, tm_eff), jnp.float32),
        grid_spec=pltpu.PrefetchScalarGridSpec(
            num_scalar_prefetch=0,
            grid=(grid,),
            in_specs=[
                pl.BlockSpec((tm_eff, D), lambda i: (i, 0)),   # x row tile
                pl.BlockSpec((D, H), lambda i: (0, 0)),        # W1 (resident)
                pl.BlockSpec((1, H), lambda i: (0, 0)),        # b1
                pl.BlockSpec((1, H), lambda i: (0, 0)),        # w2 row
                pl.BlockSpec(memory_space=pltpu.MemorySpace.SMEM),  # b2 scalar
            ],
            out_specs=pl.BlockSpec((1, tm_eff), lambda i: (i, 0)),  # lane-dense
        ),
        compiler_params=pltpu.CompilerParams(
            dimension_semantics=("parallel",),
            vmem_limit_bytes=48 * 1024 * 1024,
        ),
    )(x2, w1c, b1r, w2r, b2s)

    # (grid, tm) row-major flatten matches padded row order exactly.
    return out2.reshape(-1)[:N].reshape(B, S, 1)


def init_params(key, embedding_dim, hidden=16):
    """Deterministic init mimicking nn.Linear's uniform(-1/sqrt(fan_in), +)."""
    k1, k2, k3, k4 = jax.random.split(key, 4)
    lim1 = 1.0 / jnp.sqrt(embedding_dim)
    lim2 = 1.0 / jnp.sqrt(hidden)
    w1 = jax.random.uniform(k1, (embedding_dim, hidden), jnp.float32, -lim1, lim1)
    b1 = jax.random.uniform(k2, (1, hidden), jnp.float32, -lim1, lim1)
    w2 = jax.random.uniform(k3, (hidden, 1), jnp.float32, -lim2, lim2)
    b2 = jax.random.uniform(k4, (1, 1), jnp.float32, -lim2, lim2)
    return w1, b1, w2, b2


if __name__ == "__main__":
    key = jax.random.PRNGKey(0)
    kx, kp = jax.random.split(key)

    B, S, D = 2, 8, 32   # batch=2, seq=8, embedding_dim=32
    x = jax.random.normal(kx, (B, S, D), jnp.float32)
    w1, b1, w2, b2 = init_params(kp, D)

    out = attention_layer_forward(x, w1, b1, w2, b2)
    out = jax.block_until_ready(out)

    # Reference in plain JAX: same math, inputs rounded to bf16 like the kernel,
    # f32 accumulation, dropout(p=0) identity.
    xr = x.reshape(-1, D).astype(jnp.bfloat16).astype(jnp.float32)
    w1r = w1.astype(jnp.bfloat16).astype(jnp.float32)
    h = jnp.maximum(xr @ w1r + b1.reshape(1, -1), 0.0)
    ref = (h @ w2 + b2.reshape(1, 1)).reshape(B, S, 1)

    assert out.shape == (B, S, 1)
    assert jnp.allclose(out, ref, atol=2e-3, rtol=2e-3), \
        float(jnp.max(jnp.abs(out - ref)))

    print("KERNEL_OK")
</pallas_src>

<mosaic_0001>
module attributes {stable_mosaic.version = 11 : i64} {
  func.func @_attention_mlp_kernel(%arg0: i32, %arg1: memref<128x32xbf16, #tpu.memory_space<vmem>>, %arg2: memref<32x16xbf16, #tpu.memory_space<vmem>>, %arg3: memref<1x16xf32, #tpu.memory_space<vmem>>, %arg4: memref<1x16xf32, #tpu.memory_space<vmem>>, %arg5: memref<1x1xf32, #tpu.memory_space<smem>>, %arg6: memref<1x128xf32, #tpu.memory_space<vmem>>) attributes {dimension_semantics = [#tpu.dimension_semantics<parallel>], iteration_bounds = array<i64: 1>, scalar_prefetch = 0 : i64, scratch_operands = 0 : i64, tpu.core_type = #tpu.core_type<tc>, window_params = [{transform_indices = @transform_0, window_bounds = array<i64: 128, 32>}, {pipeline_mode = #tpu.pipeline_mode<synchronous>, transform_indices = @transform_1, window_bounds = array<i64: 32, 16>}, {pipeline_mode = #tpu.pipeline_mode<synchronous>, transform_indices = @transform_2, window_bounds = array<i64: 1, 16>}, {pipeline_mode = #tpu.pipeline_mode<synchronous>, transform_indices = @transform_3, window_bounds = array<i64: 1, 16>}, {transform_indices = @transform_4, window_bounds = array<i64: 1, 1>}, {transform_indices = @transform_5, window_bounds = array<i64: 1, 128>}]} {
    %c0 = arith.constant 0 : index
    %c0_0 = arith.constant 0 : index
    %0 = vector.load %arg1[%c0, %c0_0] : memref<128x32xbf16, #tpu.memory_space<vmem>>, vector<128x32xbf16>
    %c0_1 = arith.constant 0 : index
    %c0_2 = arith.constant 0 : index
    %1 = vector.load %arg2[%c0_1, %c0_2] : memref<32x16xbf16, #tpu.memory_space<vmem>>, vector<32x16xbf16>
    %cst = arith.constant dense<0.000000e+00> : vector<128x16xf32>
    %2 = tpu.matmul %0, %1, %cst {dimension_numbers = #tpu.dot_dimension_numbers<[1], [0], [0], [1], [0, 0, 1, 1], [], []>} : vector<128x32xbf16>, vector<32x16xbf16>, vector<128x16xf32> -> vector<128x16xf32>
    %c0_3 = arith.constant 0 : index
    %c0_4 = arith.constant 0 : index
    %3 = vector.load %arg3[%c0_3, %c0_4] : memref<1x16xf32, #tpu.memory_space<vmem>>, vector<1x16xf32>
    %4 = vector.broadcast %3 : vector<1x16xf32> to vector<128x16xf32>
    %5 = arith.addf %2, %4 : vector<128x16xf32>
    %cst_5 = arith.constant 0.000000e+00 : f32
    %6 = vector.broadcast %cst_5 : f32 to vector<128x16xf32>
    %7 = arith.maximumf %5, %6 : vector<128x16xf32>
    %c0_6 = arith.constant 0 : index
    %c0_7 = arith.constant 0 : index
    %8 = vector.load %arg4[%c0_6, %c0_7] : memref<1x16xf32, #tpu.memory_space<vmem>>, vector<1x16xf32>
    %9 = vector.broadcast %8 : vector<1x16xf32> to vector<128x16xf32>
    %10 = arith.mulf %7, %9 : vector<128x16xf32>
    %cst_8 = arith.constant dense<0.000000e+00> : vector<128xf32>
    %11 = vector.multi_reduction <add>, %10, %cst_8 [1] : vector<128x16xf32> to vector<128xf32>
    %12 = vector.shape_cast %11 : vector<128xf32> to vector<128x1xf32>
    %13 = tpu.transpose %12, [1, 0] : vector<128x1xf32> -> vector<1x128xf32>
    %c0_9 = arith.constant 0 : index
    %c0_10 = arith.constant 0 : index
    %14 = memref.load %arg5[%c0_9, %c0_10] : memref<1x1xf32, #tpu.memory_space<smem>>
    %15 = vector.broadcast %14 : f32 to vector<1x128xf32>
    %16 = arith.addf %13, %15 : vector<1x128xf32>
    %c0_11 = arith.constant 0 : index
    %c0_12 = arith.constant 0 : index
    %17 = vector.load %arg6[%c0_11, %c0_12] : memref<1x128xf32, #tpu.memory_space<vmem>>, vector<1x128xf32>
    tpu.vector_store %arg6[%c0_11, %c0_12], %16 {strides = array<i32>} : memref<1x128xf32, #tpu.memory_space<vmem>>, vector<1x128xf32>,
    return
  }
  func.func @transform_0(%arg0: i32) -> (i32, i32) {
    %c0_i32 = arith.constant 0 : i32
    %c0_i32_0 = arith.constant 0 : i32
    return %arg0, %c0_i32 : i32, i32
  }
  func.func @transform_1(%arg0: i32) -> (i32, i32) {
    %c0_i32 = arith.constant 0 : i32
    %c0_i32_0 = arith.constant 0 : i32
    %c0_i32_1 = arith.constant 0 : i32
    return %c0_i32, %c0_i32_0 : i32, i32
  }
  func.func @transform_2(%arg0: i32) -> (i32, i32) {
    %c0_i32 = arith.constant 0 : i32
    %c0_i32_0 = arith.constant 0 : i32
    %c0_i32_1 = arith.constant 0 : i32
    return %c0_i32, %c0_i32_0 : i32, i32
  }
  func.func @transform_3(%arg0: i32) -> (i32, i32) {
    %c0_i32 = arith.constant 0 : i32
    %c0_i32_0 = arith.constant 0 : i32
    %c0_i32_1 = arith.constant 0 : i32
    return %c0_i32, %c0_i32_0 : i32, i32
  }
  func.func @transform_4(%arg0: i32) -> (i32, i32) {
    %c0_i32 = arith.constant 0 : i32
    %c0_i32_0 = arith.constant 0 : i32
    %c0_i32_1 = arith.constant 0 : i32
    return %c0_i32, %c0_i32_0 : i32, i32
  }
  func.func @transform_5(%arg0: i32) -> (i32, i32) {
    %c0_i32 = arith.constant 0 : i32
    %c0_i32_0 = arith.constant 0 : i32
    return %arg0, %c0_i32 : i32, i32
  }
}

</mosaic_0001>

<bundles_post_ra>
// kernel: tpu_custom_call.1
= control target key start
LH: loop header
LB: loop body
LE: loop exit
PB: predicated region body
PF: predicated region fallthrough
CT: control target
= control target key end

     0   :  { %vm102_vm0 = vcmask 261120   ;;  %s593_s0 = inlined_call_operand.vmem [shape: bf16[128,32], index: 0, kind: input, shape index: {}]   ;;  %s594_s1 = inlined_call_operand.vmem [shape: bf16[32,16], index: 1, kind: input, shape index: {}]   ;;  %s595_s2 = inlined_call_operand.vmem [shape: f32[1,16], index: 2, kind: input, shape index: {}]   ;;  %s596_s3 = inlined_call_operand.vmem [shape: f32[1,16], index: 3, kind: input, shape index: {}]   ;;  %s597_s4 = inlined_call_operand.<no memory space> [shape: f32[1,1], index: 4, kind: input, shape index: {}]   ;;  %s598_s5 = inlined_call_operand.hbm [shape: f32[1,128], index: 5, kind: output, shape index: {}]  }
   0x1   :  { %v417_v0 = vld [vmem:[%s594_s1] sm:$0xff]   ;;  %v418_v1 = vld [vmem:[%s594_s1 + $0x8] sm:$0xff]   ;;  %v421_v4 = vld [vmem:[%s593_s0 + $0x10] sm:$0xff]  }
   0x2   :  { %392 = vmatprep.subr.bf16.mxu0 %v417_v0  ;;  %v419_v2 = vld [vmem:[%s593_s0] sm:$0xff]   ;;  %412 = vmatprep.subr.bf16.mxu1 %v417_v0  ;;  %v420_v3 = vld [vmem:[%s593_s0 + $0x8] sm:$0xff]   ;;  %v425_v7 = vld [vmem:[%s593_s0 + $0x30] sm:$0xff]  }
   0x3   :  { %393 = vmatpush3.bf16.msra.mxu0 %v417_v0  ;;  %414 = vmatpush3.bf16.msra.mxu1 %v417_v0  ;;  %v423_v5 = vld [vmem:[%s593_s0 + $0x20] sm:$0xff]   ;;  %v424_v6 = vld [vmem:[%s593_s0 + $0x28] sm:$0xff]  }
   0x4   :  { %394 = vmatprep.subr.bf16.mxu0 %v418_v1  ;;  %396 = vmatprep.mubr.msk.bf16.mxu0 %vm102_vm0, %v419_v2 }
   0x5   :  { %413 = vmatprep.subr.bf16.mxu1 %v418_v1  ;;  %404 = vmatprep.mubr.msk.bf16.mxu1 %vm102_vm0, %v423_v5 }
   0x7   :  { %395 = vmatpush3.bf16.msra.mxu0 %v418_v1  ;;  %415 = vmatpush3.bf16.msra.mxu1 %v418_v1 }
   0xa   :  { %397 = vmatmul.mubr.msk.bf16.vlgmr.msra.gmra.mrb[0].mxu0 %vm102_vm0, %v420_v3  ;;  %405 = vmatmul.mubr.msk.bf16.vlgmr.msra.gmra.mrb[0].mxu1 %vm102_vm0, %v424_v6 }
   0xb   :  { %11 = vsyncpa [#allocation4], 0  ;;  %400 = vmatprep.mubr.msk.bf16.mxu0 %vm102_vm0, %v421_v4  ;;  %408 = vmatprep.mubr.msk.bf16.mxu1 %vm102_vm0, %v425_v7  ;;  %v422_v8 = vld [vmem:[%s593_s0 + $0x18] sm:$0xff]   ;;  %v523_v10 = vld [vmem:[%s595_s2] ss:$0 sm:$0xff]  ;;  %vm263_vm1 = vcmask 130048  }
   0xc   :  { %v426_v9 = vld [vmem:[%s593_s0 + $0x38] sm:$0xff]   ;;  %v530_v18 = vld [vmem:[%s596_s3] ss:$0 sm:$0xff]  ;;  %s451_s15 = smov [#allocation3]  }
   0xd   :  { %s354_s16 = sshll.u32 %s451_s15, 4  ;;  %s355_s16 = int_to_ptr.vmem [resolvable:$true] %s354_s16 }
   0xe   :  { %s427_s17 = scalar_lea.vmem %s355_s16, 16  ;;  %s431_s18 = scalar_lea.vmem %s355_s16, 32 }
   0xf   :  { %p428_p0 = scmp.ne.s32.totalorder %s355_s16, %s427_s17  ;;  %p432_p1 = scmp.lt.s32.totalorder %s355_s16, %s355_s16 }
  0x10   :  { %p433_p2 = scmp.lt.s32.totalorder %s431_s18, %s427_s17 }
  0x12   :  { %401 = vmatmul.mubr.msk.bf16.gmra.mrb[4].mxu0 %vm102_vm0, %v422_v8  ;;  %409 = vmatmul.mubr.msk.bf16.gmra.mrb[4].mxu1 %vm102_vm0, %v426_v9  ;;  %p434_p3 = por %p433_p2, %p432_p1 }
  0x14   :  { %p435_p4 = pnand %p434_p3, %p428_p0 }
  0xdd   :  { %v398_v11 = vpop.f32.mrb[0].mxu0  ;;  %v406_v12 = vpop.f32.mrb[0].mxu1 }
  0xde   :  { %v170_v13 = vadd.f32 %v398_v11, %v523_v10  ;;  %v161_v14 = vpop.f32.mrb[1].mxu0  ;;  %v193_v15 = vpop.f32.mrb[1].mxu1  ;;  %v202_v53 = vadd.f32 %v406_v12, %v523_v10 }
  0xdf   :  { %v162_v16 = vadd.f32 %v523_v10, %v161_v14  ;;  %v399_v17 = vpop.f32.mrb[2].mxu0  ;;  %v407_v19 = vpop.f32.mrb[2].mxu1  ;;  %v194_v38 = vadd.f32 %v523_v10, %v193_v15 }
  0xe0   :  { %v226_v20 = vmax.f32 %v170_v13, 0.0  ;;  %v173_v21 = vadd.f32 %v399_v17, %v523_v10  ;;  %v164_v22 = vpop.f32.mrb[3].mxu0  ;;  %v196_v23 = vpop.f32.mrb[3].mxu1  ;;  %v205_v60 = vadd.f32 %v407_v19, %v523_v10  ;;  %v234_v62 = vmax.f32 %v202_v53, 0.0 }
  0xe1   :  { %v224_v24 = vmax.f32 %v162_v16, 0.0  ;;  %v165_v25 = vadd.f32 %v523_v10, %v164_v22  ;;  %v197_v51 = vadd.f32 %v523_v10, %v196_v23  ;;  %v232_v54 = vmax.f32 %v194_v38, 0.0 }
  0xe2   :  { %v227_v26 = vmax.f32 %v173_v21, 0.0  ;;  %v249_v27 = vmul.f32 %v530_v18, %v226_v20  ;;  %v235_v4 = vmax.f32 %v205_v60, 0.0  ;;  %v257_v7 = vmul.f32 %v530_v18, %v234_v62 }
  0xe3   :  { %v225_v28 = vmax.f32 %v165_v25, 0.0  ;;  %v247_v29 = vmul.f32 %v530_v18, %v224_v24  ;;  %v233_v61 = vmax.f32 %v197_v51, 0.0  ;;  %v255_v63 = vmul.f32 %v530_v18, %v232_v54 }
  0xe4   :  { %v270_v30 = vsel %vm263_vm1, %v249_v27, 0.0  ;;  %v250_v31 = vmul.f32 %v530_v18, %v227_v26  ;;  %v258_v14 = vmul.f32 %v530_v18, %v235_v4  ;;  %v294_v17 = vsel %vm263_vm1, %v257_v7, 0.0 }
  0xe5   :  { %271 = vadd.xlane.f32.xlu1 %v270_v30  ;;  %v402_v32 = vpop.f32.mrb[4].mxu0  ;;  %v264_v33 = vsel %vm263_vm1, %v247_v29, 0.0  ;;  %v248_v34 = vmul.f32 %v530_v18, %v225_v28  ;;  %v410_v35 = vpop.f32.mrb[4].mxu1  ;;  %v256_v5 = vmul.f32 %v530_v18, %v233_v61  ;;  %v288_v9 = vsel %vm263_vm1, %v255_v63, 0.0 }
  0xe6   :  { %v186_v36 = vadd.f32 %v402_v32, %v523_v10  ;;  %v177_v37 = vpop.f32.mrb[5].mxu0  ;;  %265 = vadd.xlane.f32.xlu0 %v264_v33  ;;  %v209_v39 = vpop.f32.mrb[5].mxu1  ;;  %v273_v46 = vsel %vm263_vm1, %v250_v31, 0.0  ;;  %v218_v11 = vadd.f32 %v410_v35, %v523_v10  ;;  %v297_v21 = vsel %vm263_vm1, %v258_v14, 0.0 }
  0xe7   :  { %v178_v40 = vadd.f32 %v523_v10, %v177_v37  ;;  %v403_v41 = vpop.f32.mrb[6].mxu0  ;;  %v411_v42 = vpop.f32.mrb[6].mxu1  ;;  %v267_v50 = vsel %vm263_vm1, %v248_v34, 0.0  ;;  %v210_v3 = vadd.f32 %v523_v10, %v209_v39  ;;  %v291_v13 = vsel %vm263_vm1, %v256_v5, 0.0 }
  0xe8   :  { %v230_v43 = vmax.f32 %v186_v36, 0.0  ;;  %v189_v44 = vadd.f32 %v403_v41, %v523_v10  ;;  %v180_v45 = vpop.f32.mrb[7].mxu0  ;;  %v212_v47 = vpop.f32.mrb[7].mxu1  ;;  %v221_v15 = vadd.f32 %v411_v42, %v523_v10  ;;  %v238_v19 = vmax.f32 %v218_v11, 0.0 }
  0xe9   :  { %v228_v48 = vmax.f32 %v178_v40, 0.0  ;;  %v181_v49 = vadd.f32 %v523_v10, %v180_v45  ;;  %274 = vadd.xlane.f32.xlu1 %v273_v46  ;;  %v213_v6 = vadd.f32 %v523_v10, %v212_v47  ;;  %v236_v12 = vmax.f32 %v210_v3, 0.0 }
  0xea   :  { %268 = vadd.xlane.f32.xlu0 %v267_v50  ;;  %v253_v52 = vmul.f32 %v530_v18, %v230_v43  ;;  %v231_v55 = vmax.f32 %v189_v44, 0.0  ;;  %v239_v22 = vmax.f32 %v221_v15, 0.0  ;;  %v261_v25 = vmul.f32 %v530_v18, %v238_v19 }
  0xeb   :  { %v229_v56 = vmax.f32 %v181_v49, 0.0  ;;  %v251_v57 = vmul.f32 %v530_v18, %v228_v48  ;;  %v237_v16 = vmax.f32 %v213_v6, 0.0  ;;  %v259_v20 = vmul.f32 %v530_v18, %v236_v12 }
  0xec   :  { %v282_v58 = vsel %vm263_vm1, %v253_v52, 0.0  ;;  %v254_v2 = vmul.f32 %v530_v18, %v231_v55  ;;  %v262_v26 = vmul.f32 %v530_v18, %v239_v22  ;;  %v306_v27 = vsel %vm263_vm1, %v261_v25, 0.0 }
  0xed   :  { %v252_v59 = vmul.f32 %v530_v18, %v229_v56  ;;  %v276_v1 = vsel %vm263_vm1, %v251_v57, 0.0  ;;  %v260_v23 = vmul.f32 %v530_v18, %v237_v16  ;;  %v300_v24 = vsel %vm263_vm1, %v259_v20, 0.0 }
  0xee   :  { %283 = vadd.xlane.f32.xlu0 %v282_v58  ;;  %v285_v8 = vsel %vm263_vm1, %v254_v2, 0.0  ;;  %v309_v28 = vsel %vm263_vm1, %v262_v26, 0.0  ;;  %v345_v44 = vstv %s597_s4 }
  0xef   :  { %v279_v0 = vsel %vm263_vm1, %v252_v59, 0.0  ;;  %v303_v10 = vsel %vm263_vm1, %v260_v23, 0.0 }
  0xf0   :  { %280 = vadd.xlane.f32.xlu1 %v279_v0 }
  0xf2   :  { %277 = vadd.xlane.f32.xlu0 %v276_v1 }
  0xf4   :  { %286 = vadd.xlane.f32.xlu1 %v285_v8 }
  0xf6   :  { %289 = vadd.xlane.f32.xlu0 %v288_v9 }
  0xf8   :  { %292 = vadd.xlane.f32.xlu1 %v291_v13 }
  0xfa   :  { %295 = vadd.xlane.f32.xlu0 %v294_v17 }
  0xfc   :  { %298 = vadd.xlane.f32.xlu1 %v297_v21 }
  0xfe   :  { %301 = vadd.xlane.f32.xlu0 %v300_v24 }
 0x100   :  { %304 = vadd.xlane.f32.xlu1 %v303_v10 }
 0x102   :  { %307 = vadd.xlane.f32.xlu0 %v306_v27 }
 0x104   :  { %310 = vadd.xlane.f32.xlu1 %v309_v28 }
 0x172   :  { %v272_v31 = vpop.xlane.xlu1 %271 }
 0x173   :  { %v266_v29 = vpop.xlane.xlu0 %265 }
 0x174   :  { %312 = vxpose.xlu0.b32.start [1/16] (narrow) %v266_v29, 8 }
 0x176   :  { %v275_v33 = vpop.xlane.xlu1 %274 }
 0x177   :  { %v269_v30 = vpop.xlane.xlu0 %268 }
 0x178   :  { %313 = vxpose.xlu0.b32.cont [2/16] (narrow) %v269_v30, 8 }
 0x17b   :  { %v284_v32 = vpop.xlane.xlu0 %283 }
 0x17c   :  { %314 = vxpose.xlu0.b32.cont [3/16] (narrow) %v272_v31, 8 }
 0x17d   :  { %v281_v18 = vpop.xlane.xlu1 %280 }
 0x17f   :  { %v278_v34 = vpop.xlane.xlu0 %277 }
 0x180   :  { %315 = vxpose.xlu0.b32.cont [4/16] (narrow) %v275_v33, 8 }
 0x181   :  { %v287_v35 = vpop.xlane.xlu1 %286 }
 0x183   :  { %v290_v36 = vpop.xlane.xlu0 %289 }
 0x184   :  { %316 = vxpose.xlu0.b32.cont [5/16] (narrow) %v278_v34, 8 }
 0x185   :  { %v293_v37 = vpop.xlane.xlu1 %292 }
 0x187   :  { %v296_v38 = vpop.xlane.xlu0 %295 }
 0x188   :  { %317 = vxpose.xlu0.b32.cont [6/16] (narrow) %v281_v18, 8 }
 0x189   :  { %v299_v39 = vpop.xlane.xlu1 %298 }
 0x18b   :  { %v302_v40 = vpop.xlane.xlu0 %301 }
 0x18c   :  { %318 = vxpose.xlu0.b32.cont [7/16] (narrow) %v284_v32, 8 }
 0x18d   :  { %v305_v41 = vpop.xlane.xlu1 %304 }
 0x18f   :  { %v308_v42 = vpop.xlane.xlu0 %307 }
 0x190   :  { %319 = vxpose.xlu0.b32.cont [8/16] (narrow) %v287_v35, 8 }
 0x191   :  { %v311_v43 = vpop.xlane.xlu1 %310 }
 0x194   :  { %320 = vxpose.xlu0.b32.cont [9/16] (narrow) %v290_v36, 8 }
 0x198   :  { %321 = vxpose.xlu0.b32.cont [10/16] (narrow) %v293_v37, 8 }
 0x19c   :  { %322 = vxpose.xlu0.b32.cont [11/16] (narrow) %v296_v38, 8 }
 0x1a0   :  { %323 = vxpose.xlu0.b32.cont [12/16] (narrow) %v299_v39, 8 }
 0x1a4   :  { %324 = vxpose.xlu0.b32.cont [13/16] (narrow) %v302_v40, 8 }
 0x1a8   :  { %325 = vxpose.xlu0.b32.cont [14/16] (narrow) %v305_v41, 8 }
 0x1ac   :  { %326 = vxpose.xlu0.b32.cont [15/16] (narrow) %v308_v42, 8 }
 0x1b0   :  { %327 = vxpose.xlu0.b32.end [16/16] (narrow) %v311_v43, 8 }
 0x1f4   :  { %v328_v45 = vpop.trf.xlu0 }
 0x1f5   :  { %v346_v46 = vadd.f32 %v345_v44, %v328_v45 }
 0x1f7   :  { %347 = vst [vmem:[#allocation3] sm:$0x1] %v346_v46 }
 0x1f8   :  { %438 = shalt.err (!%p435_p4)
}
 0x1f9   :  { %s439_s21 = scalar_lea.hbm %s598_s5, 16 }
 0x1fa   :  { %p440_p5 = scmp.ne.s32.totalorder %s598_s5, %s439_s21  ;;  %p443_p6 = scmp.lt.u32.totalorder %s439_s21, %s598_s5 }
 0x1fc   :  { %p445_p7 = pnand %p443_p6, %p440_p5 }
 0x1fe   :  { %448 = shalt.err (!%p445_p7)
}
 0x1ff   :  { %357 = dma.vmem_to_hbm [thread:$0]  %s355_s16, 16, %s598_s5, [#allocation4]  }
 0x200   :  { %449 = dma.done.wait [#allocation4], 16  }
 0x201   :  { %450 = vsyncadd [#allocation4], 4294967280 }
 0x202   :  { %361 = vsyncpa [#allocation4], 1 }

</bundles_post_ra>
